<compile_context>
chip_gen: v7x
topology: tpu7x:2x2x1
jax: 0.10.0
libtpu: 0.0.40
codegen_flags: <defaults>
</compile_context>

<pallas_src>
import functools

import jax
import jax.numpy as jnp
from jax.experimental import pallas as pl
from jax.experimental.pallas import tpu as pltpu


def _cdiv(a, b):
    return (a + b - 1) // b


def _pool_kernel(x_ref, sum_ref, max_ref, sum_acc, max_acc, *, hw_tile, hw_total):
    """Streaming global sum/max pool over the last (HW) axis of one block."""
    hwi = pl.program_id(2)
    n_hw = pl.num_programs(2)

    @pl.when(hwi == 0)
    def _init():
        sum_acc[...] = jnp.zeros_like(sum_acc)
        max_acc[...] = jnp.full_like(max_acc, -jnp.inf)

    rem = hw_total % hw_tile          # trace-time Python int
    needs_mask = rem != 0

    def _accumulate(masked):
        x = x_ref[...]                                      # (bt, Ct, hw_tile)
        x32 = x.astype(jnp.float32)
        if masked:
            valid = jax.lax.broadcasted_iota(jnp.int32, x.shape, 2) < rem
            x32 = jnp.where(valid, x32, 0.0)
            x = jnp.where(valid, x, jnp.array(-jnp.inf, dtype=x.dtype))
        sum_acc[...] += jnp.sum(x32, axis=2)
        # Max is exact in the native dtype (bf16 stays packed on v6e/v7x).
        max_acc[...] = jnp.maximum(max_acc[...], jnp.max(x, axis=2))

    if needs_mask:
        # Steady state (all but the last chunk): no masking ops at all.
        @pl.when(hwi < n_hw - 1)
        def _steady():
            _accumulate(masked=False)

        # Last (padded) chunk only: mask out-of-range positions.
        @pl.when(hwi == n_hw - 1)
        def _last():
            _accumulate(masked=True)
    else:
        _accumulate(masked=False)

    @pl.when(hwi == n_hw - 1)
    def _finalize():
        sum_ref[...] = sum_acc[...][..., None]
        max_ref[...] = max_acc[...].astype(max_ref.dtype)[..., None]


def _get_vmem_capacity_bytes():
    try:
        info = pltpu.get_tpu_info()
        cap = getattr(info, "vmem_capacity_bytes", None)
        if cap:
            return int(cap)
    except Exception:
        pass
    # Conservative fallback: smallest physical VMEM among supported chips
    # (v7x = 64 MiB); v5e/v6e have 128 MiB, so this is always safe.
    return 64 * 1024 * 1024


def _choose_tiles(B, C, HW, itemsize, target_block_bytes):
    """Pick the x block shape (bt, ct, hw_tile)."""
    row_bytes = C * HW * itemsize
    if row_bytes >= target_block_bytes:
        # Large feature map: one batch element per block, chunk over HW.
        bt = 1
        ct = C
        # When B == 1 the batch axis has a single parallel step; split the
        # channel axis so v7x's two TensorCores both get work.  Because
        # hw_tile is re-derived from ct, the per-step block bytes (and hence
        # the total number of grid steps) are unchanged on single-TC chips.
        if B == 1 and C >= 16 and C % 16 == 0:
            ct = C // 2
        hw_tile = (target_block_bytes // (ct * itemsize)) // 128 * 128
        hw_tile = max(hw_tile, 128)
        if hw_tile >= HW:
            hw_tile = HW                      # full dim (no mask needed)
    else:
        # Small feature map: whole HW per block, as many batch rows as fit.
        # (No forced bt-halving: on single-TC v5e/v6e it only added overhead.)
        ct = C
        hw_tile = HW
        bt = min(B, max(1, target_block_bytes // row_bytes))
    return bt, ct, hw_tile


def _global_pool(x_flat, bt, ct, hw_tile, vmem_limit_bytes):
    """Returns (sum_pool, max_pool) of shape (B, C), float32."""
    B, C, HW = x_flat.shape
    grid = (_cdiv(B, bt), _cdiv(C, ct), _cdiv(HW, hw_tile))

    kernel = functools.partial(_pool_kernel, hw_tile=hw_tile, hw_total=HW)

    itemsize = x_flat.dtype.itemsize
    cost = pl.CostEstimate(
        flops=int(2 * B * C * HW),
        transcendentals=0,
        bytes_accessed=int(B * C * HW * itemsize + 2 * B * C * 4),
    )

    sum_out, max_out = pl.pallas_call(
        kernel,
        out_shape=(
            jax.ShapeDtypeStruct((B, C, 1), jnp.float32),
            jax.ShapeDtypeStruct((B, C, 1), jnp.float32),
        ),
        grid_spec=pltpu.PrefetchScalarGridSpec(
            num_scalar_prefetch=0,
            grid=grid,
            in_specs=[
                pl.BlockSpec((bt, ct, hw_tile), lambda b, c, h: (b, c, h)),
            ],
            out_specs=[
                pl.BlockSpec((bt, ct, 1), lambda b, c, h: (b, c, 0)),
                pl.BlockSpec((bt, ct, 1), lambda b, c, h: (b, c, 0)),
            ],
            scratch_shapes=[
                pltpu.VMEM((bt, ct), jnp.float32),     # running sum (f32)
                pltpu.VMEM((bt, ct), x_flat.dtype),    # running max (native)
            ],
        ),
        compiler_params=pltpu.CompilerParams(
            dimension_semantics=("parallel", "parallel", "arbitrary"),
            vmem_limit_bytes=vmem_limit_bytes,
        ),
        cost_estimate=cost,
    )(x_flat)
    return sum_out[..., 0], max_out[..., 0]


def channel_attention(x, w1, w2, *, target_block_bytes=None):
    """CBAM-style channel attention.

    x:  (B, C, H, W)
    w1: (Cr, C) -- fc1 = Conv2d(C, Cr, 1, bias=False).weight squeezed
    w2: (C, Cr) -- fc2 = Conv2d(Cr, C, 1, bias=False).weight squeezed
    Returns the sigmoid attention map of shape (B, C, 1, 1).
    """
    B, C, H, W = x.shape
    HW = H * W
    x_flat = x.reshape(B, C, HW)
    itemsize = x.dtype.itemsize

    vmem_cap = _get_vmem_capacity_bytes()
    if target_block_bytes is None:
        # ~8 MiB blocks (~16 MiB double-buffered) amortize the ~0.35 us/step
        # grid overhead while staying well inside v7x's 64 MiB physical VMEM.
        target_block_bytes = min(8 * 1024 * 1024, vmem_cap // 8)

    bt, ct, hw_tile = _choose_tiles(B, C, HW, itemsize, target_block_bytes)

    block_bytes = bt * ct * hw_tile * itemsize
    # Double-buffered input + scratch/outputs + headroom, capped at ~3/4 of
    # physical VMEM (raises v5e's 16 MiB scoped default, respects v7x 64 MiB).
    needed = 2 * block_bytes + 4 * bt * ct * 4 + (4 << 20)
    vmem_limit_bytes = int(min(max(needed, 16 << 20), (vmem_cap * 3) // 4))

    sum_pool, max_pool = _global_pool(x_flat, bt, ct, hw_tile, vmem_limit_bytes)

    # Tiny shared MLP + sigmoid on the pooled (B, C) stats. Done in the JAX
    # wrapper (negligible flops) so the kernel's parallel grid axes stay
    # independent of the channel mixing (v7x megacore when B == 1).
    avg = sum_pool * (1.0 / HW)                         # (B, C) f32
    mx = max_pool                                       # (B, C) f32
    w1f = w1.astype(jnp.float32)
    w2f = w2.astype(jnp.float32)

    def mlp(v):
        return jnp.maximum(v @ w1f.T, 0.0) @ w2f.T

    out = jax.nn.sigmoid(mlp(avg) + mlp(mx)).astype(x.dtype)
    return out.reshape(B, C, 1, 1)


def reference(x, w1, w2):
    # Pure-JAX reference mirroring the PyTorch forward.
    xf = x.astype(jnp.float32)
    avg = jnp.mean(xf, axis=(2, 3))
    mx = jnp.max(xf, axis=(2, 3))
    w1f = w1.astype(jnp.float32)
    w2f = w2.astype(jnp.float32)

    def mlp(v):
        return jnp.maximum(v @ w1f.T, 0.0) @ w2f.T

    out = jax.nn.sigmoid(mlp(avg) + mlp(mx)).astype(x.dtype)
    return out[:, :, None, None]


if __name__ == "__main__":
    key = jax.random.PRNGKey(0)

    # Case 1: basic small config (in_planes=64, ratio=16 -> hidden=4), one block.
    B, C, H, W = 2, 64, 16, 16
    Cr = C // 16
    kx, k1, k2, key = jax.random.split(key, 4)
    x = jax.random.normal(kx, (B, C, H, W), dtype=jnp.float32)
    w1 = jax.random.normal(k1, (Cr, C), dtype=jnp.float32) * 0.1   # fc1.weight
    w2 = jax.random.normal(k2, (C, Cr), dtype=jnp.float32) * 0.1   # fc2.weight

    fn1 = jax.jit(channel_attention)
    out = jax.block_until_ready(fn1(x, w1, w2))
    ref = jax.block_until_ready(reference(x, w1, w2))
    assert out.shape == (B, C, 1, 1), out.shape
    assert jnp.allclose(out, ref, atol=1e-5, rtol=1e-5), float(
        jnp.max(jnp.abs(out - ref)))

    # Case 2: force HW-chunked streaming with HW % hw_tile != 0, exercising the
    # steady/masked split (chunks of 256 + padded 144).
    B2, C2, H2, W2 = 2, 64, 20, 20
    Cr2 = C2 // 16
    kx, k1, k2, key = jax.random.split(key, 4)
    x2 = jax.random.normal(kx, (B2, C2, H2, W2), dtype=jnp.float32)
    w1b = jax.random.normal(k1, (Cr2, C2), dtype=jnp.float32) * 0.1
    w2b = jax.random.normal(k2, (C2, Cr2), dtype=jnp.float32) * 0.1

    fn2 = jax.jit(functools.partial(channel_attention,
                                    target_block_bytes=64 * 1024))
    out2 = jax.block_until_ready(fn2(x2, w1b, w2b))
    ref2 = jax.block_until_ready(reference(x2, w1b, w2b))
    assert out2.shape == (B2, C2, 1, 1), out2.shape
    assert jnp.allclose(out2, ref2, atol=1e-5, rtol=1e-5), float(
        jnp.max(jnp.abs(out2 - ref2)))

    # Case 3: B == 1 path -> channel axis split into 2 parallel blocks,
    # plus a padded final HW chunk (1600 = 1024 + padded 576).
    B3, C3, H3, W3 = 1, 64, 40, 40
    Cr3 = C3 // 16
    kx, k1, k2, key = jax.random.split(key, 4)
    x3 = jax.random.normal(kx, (B3, C3, H3, W3), dtype=jnp.float32)
    w1c = jax.random.normal(k1, (Cr3, C3), dtype=jnp.float32) * 0.1
    w2c = jax.random.normal(k2, (C3, Cr3), dtype=jnp.float32) * 0.1

    fn3 = jax.jit(functools.partial(channel_attention,
                                    target_block_bytes=128 * 1024))
    out3 = jax.block_until_ready(fn3(x3, w1c, w2c))
    ref3 = jax.block_until_ready(reference(x3, w1c, w2c))
    assert out3.shape == (B3, C3, 1, 1), out3.shape
    assert jnp.allclose(out3, ref3, atol=1e-5, rtol=1e-5), float(
        jnp.max(jnp.abs(out3 - ref3)))

    # Case 4: bf16 input (native-dtype max accumulator, f32 sum path).
    x4 = x.astype(jnp.bfloat16)
    out4 = jax.block_until_ready(jax.jit(channel_attention)(x4, w1, w2))
    ref4 = jax.block_until_ready(reference(x4, w1, w2))
    assert out4.shape == (B, C, 1, 1), out4.shape
    assert jnp.allclose(out4.astype(jnp.float32), ref4.astype(jnp.float32),
                        atol=1e-2, rtol=1e-2), float(
        jnp.max(jnp.abs(out4.astype(jnp.float32) - ref4.astype(jnp.float32))))

    print("KERNEL_OK")
</pallas_src>

<mosaic_0001>
module attributes {stable_mosaic.version = 11 : i64} {
  func.func @_pool_kernel(%arg0: i32, %arg1: i32, %arg2: i32, %arg3: memref<2x64x256xf32, #tpu.memory_space<vmem>>, %arg4: memref<2x64x1xf32, #tpu.memory_space<vmem>>, %arg5: memref<2x64x1xf32, #tpu.memory_space<vmem>>, %arg6: memref<2x64xf32, #tpu.memory_space<vmem>>, %arg7: memref<2x64xf32, #tpu.memory_space<vmem>>) attributes {dimension_semantics = [#tpu.dimension_semantics<parallel>, #tpu.dimension_semantics<parallel>, #tpu.dimension_semantics<arbitrary>], iteration_bounds = array<i64: 1, 1, 1>, scalar_prefetch = 0 : i64, scratch_operands = 2 : i64, tpu.core_type = #tpu.core_type<tc>, window_params = [{transform_indices = @transform_0, window_bounds = array<i64: 2, 64, 256>}, {transform_indices = @transform_1, window_bounds = array<i64: 2, 64, 1>}, {transform_indices = @transform_2, window_bounds = array<i64: 2, 64, 1>}]} {
    %c0_i32 = arith.constant 0 : i32
    %0 = arith.cmpi eq, %arg2, %c0_i32 : i32
    %1 = arith.extui %0 : i1 to i32
    %c0_i32_0 = arith.constant 0 : i32
    %2 = arith.cmpi ne, %1, %c0_i32_0 : i32
    scf.if %2 {
      %cst_14 = arith.constant 0.000000e+00 : f32
      %15 = vector.broadcast %cst_14 : f32 to vector<2x64xf32>
      %c0_15 = arith.constant 0 : index
      %c0_16 = arith.constant 0 : index
      %16 = vector.load %arg6[%c0_15, %c0_16] : memref<2x64xf32, #tpu.memory_space<vmem>>, vector<2x64xf32>
      tpu.vector_store %arg6[%c0_15, %c0_16], %15 {strides = array<i32>} : memref<2x64xf32, #tpu.memory_space<vmem>>, vector<2x64xf32>,
      %cst_17 = arith.constant 0xFF800000 : f32
      %17 = vector.broadcast %cst_17 : f32 to vector<2x64xf32>
      %c0_18 = arith.constant 0 : index
      %c0_19 = arith.constant 0 : index
      %18 = vector.load %arg7[%c0_18, %c0_19] : memref<2x64xf32, #tpu.memory_space<vmem>>, vector<2x64xf32>
      tpu.vector_store %arg7[%c0_18, %c0_19], %17 {strides = array<i32>} : memref<2x64xf32, #tpu.memory_space<vmem>>, vector<2x64xf32>,
    } else {
    }
    %c0 = arith.constant 0 : index
    %c0_1 = arith.constant 0 : index
    %c0_2 = arith.constant 0 : index
    %3 = vector.load %arg3[%c0, %c0_1, %c0_2] : memref<2x64x256xf32, #tpu.memory_space<vmem>>, vector<2x64x256xf32>
    %c0_3 = arith.constant 0 : index
    %c0_4 = arith.constant 0 : index
    %4 = vector.load %arg6[%c0_3, %c0_4] : memref<2x64xf32, #tpu.memory_space<vmem>>, vector<2x64xf32>
    %cst = arith.constant dense<0.000000e+00> : vector<2x64xf32>
    %5 = vector.multi_reduction <add>, %3, %cst [2] : vector<2x64x256xf32> to vector<2x64xf32>
    %6 = arith.addf %4, %5 : vector<2x64xf32>
    %c0_5 = arith.constant 0 : index
    %c0_6 = arith.constant 0 : index
    %7 = vector.load %arg6[%c0_5, %c0_6] : memref<2x64xf32, #tpu.memory_space<vmem>>, vector<2x64xf32>
    tpu.vector_store %arg6[%c0_5, %c0_6], %6 {strides = array<i32>} : memref<2x64xf32, #tpu.memory_space<vmem>>, vector<2x64xf32>,
    %c0_7 = arith.constant 0 : index
    %c0_8 = arith.constant 0 : index
    %8 = vector.load %arg7[%c0_7, %c0_8] : memref<2x64xf32, #tpu.memory_space<vmem>>, vector<2x64xf32>
    %cst_9 = arith.constant dense<0xFF800000> : vector<2x64xf32>
    %9 = vector.multi_reduction <maximumf>, %3, %cst_9 [2] : vector<2x64x256xf32> to vector<2x64xf32>
    %10 = arith.maximumf %8, %9 : vector<2x64xf32>
    %c0_10 = arith.constant 0 : index
    %c0_11 = arith.constant 0 : index
    %11 = vector.load %arg7[%c0_10, %c0_11] : memref<2x64xf32, #tpu.memory_space<vmem>>, vector<2x64xf32>
    tpu.vector_store %arg7[%c0_10, %c0_11], %10 {strides = array<i32>} : memref<2x64xf32, #tpu.memory_space<vmem>>, vector<2x64xf32>,
    %c0_i32_12 = arith.constant 0 : i32
    %12 = arith.cmpi eq, %arg2, %c0_i32_12 : i32
    %13 = arith.extui %12 : i1 to i32
    %c0_i32_13 = arith.constant 0 : i32
    %14 = arith.cmpi ne, %13, %c0_i32_13 : i32
    scf.if %14 {
      %c0_14 = arith.constant 0 : index
      %c0_15 = arith.constant 0 : index
      %15 = vector.load %arg6[%c0_14, %c0_15] : memref<2x64xf32, #tpu.memory_space<vmem>>, vector<2x64xf32>
      %16 = vector.shape_cast %15 : vector<2x64xf32> to vector<2x64x1xf32>
      %c0_16 = arith.constant 0 : index
      %c0_17 = arith.constant 0 : index
      %c0_18 = arith.constant 0 : index
      %17 = vector.load %arg4[%c0_16, %c0_17, %c0_18] : memref<2x64x1xf32, #tpu.memory_space<vmem>>, vector<2x64x1xf32>
      tpu.vector_store %arg4[%c0_16, %c0_17, %c0_18], %16 {strides = array<i32>} : memref<2x64x1xf32, #tpu.memory_space<vmem>>, vector<2x64x1xf32>,
      %c0_19 = arith.constant 0 : index
      %c0_20 = arith.constant 0 : index
      %18 = vector.load %arg7[%c0_19, %c0_20] : memref<2x64xf32, #tpu.memory_space<vmem>>, vector<2x64xf32>
      %19 = vector.shape_cast %18 : vector<2x64xf32> to vector<2x64x1xf32>
      %c0_21 = arith.constant 0 : index
      %c0_22 = arith.constant 0 : index
      %c0_23 = arith.constant 0 : index
      %20 = vector.load %arg5[%c0_21, %c0_22, %c0_23] : memref<2x64x1xf32, #tpu.memory_space<vmem>>, vector<2x64x1xf32>
      tpu.vector_store %arg5[%c0_21, %c0_22, %c0_23], %19 {strides = array<i32>} : memref<2x64x1xf32, #tpu.memory_space<vmem>>, vector<2x64x1xf32>,
    } else {
    }
    return
  }
  func.func @transform_0(%arg0: i32, %arg1: i32, %arg2: i32) -> (i32, i32, i32) {
    %c0_i32 = arith.constant 0 : i32
    return %arg0, %arg1, %arg2 : i32, i32, i32
  }
  func.func @transform_1(%arg0: i32, %arg1: i32, %arg2: i32) -> (i32, i32, i32) {
    %c0_i32 = arith.constant 0 : i32
    %c0_i32_0 = arith.constant 0 : i32
    return %arg0, %arg1, %c0_i32 : i32, i32, i32
  }
  func.func @transform_2(%arg0: i32, %arg1: i32, %arg2: i32) -> (i32, i32, i32) {
    %c0_i32 = arith.constant 0 : i32
    %c0_i32_0 = arith.constant 0 : i32
    return %arg0, %arg1, %c0_i32 : i32, i32, i32
  }
}

</mosaic_0001>

<bundles_post_ra>
// kernel: channel_attention.1
= control target key start
LH: loop header
LB: loop body
LE: loop exit
PB: predicated region body
PF: predicated region fallthrough
CT: control target
= control target key end

     0   :  { %vm14_vm0 = vcmask 517120   ;;  %vm125_vm1 = vcmask 130112   ;;  %vm132_vm2 = vcmask 195712   ;;  %vm139_vm3 = vcmask 261312   ;;  %s938_s0 = inlined_call_operand.vmem [shape: f32[2,64,256], index: 0, kind: input, shape index: {}]   ;;  %s939_s1 = inlined_call_operand.vmem [shape: f32[2,64,1], index: 1, kind: output, shape index: {0}]   ;;  %s940_s2 = inlined_call_operand.vmem [shape: f32[2,64,1], index: 2, kind: output, shape index: {1}]  }
   0x1   :  { %v33_v0 = vld [vmem:[%s938_s0 + $0x80] sm:$0xff]  ;;  %v34_v1 = vld [vmem:[%s938_s0 + $0x88] sm:$0xff]  ;;  %v35_v5 = vld [vmem:[%s938_s0 + $0x90] sm:$0xff]  ;;  %vm146_vm4 = vcmask 326912   ;;  %vm153_vm5 = vcmask 392512   ;;  %vm160_vm6 = vcmask 458112  }
   0x2   :  { %v17_v2 = vld [vmem:[%s938_s0] sm:$0xff]  ;;  %v74_v3 = vadd.f32 %v34_v1, %v33_v0  ;;  %v18_v4 = vld [vmem:[%s938_s0 + $0x8] sm:$0xff]  ;;  %v36_v6 = vld [vmem:[%s938_s0 + $0x98] sm:$0xff]  ;;  %v239_v15 = vmax.f32 %v33_v0, %v34_v1  ;;  %v549_v0 = vmov 0.0   ;;  %v550_v1 = vmov -inf  }
   0x3   :  { %v50_v7 = vadd.f32 %v18_v4, %v17_v2  ;;  %v19_v8 = vld [vmem:[%s938_s0 + $0x10] sm:$0xff]  ;;  %v20_v9 = vld [vmem:[%s938_s0 + $0x18] sm:$0xff]  ;;  %v77_v10 = vadd.f32 %v36_v6, %v35_v5  ;;  %v215_v13 = vmax.f32 %v17_v2, %v18_v4  ;;  %v242_v14 = vmax.f32 %v35_v5, %v36_v6  ;;  %v37_v16 = vld [vmem:[%s938_s0 + $0xa0] sm:$0xff]  ;;  %15 = vst.msk [vmem:[#allocation2] sm:$0x3] %vm14_vm0, %v549_v0 }
   0x4   :  { %75 = vadd.xlane.f32.xlu1 %v74_v3  ;;  %v53_v11 = vadd.f32 %v20_v9, %v19_v8  ;;  %v218_v12 = vmax.f32 %v19_v8, %v20_v9  ;;  %v38_v17 = vld [vmem:[%s938_s0 + $0xa8] sm:$0xff]  ;;  %v21_v18 = vld [vmem:[%s938_s0 + $0x20] sm:$0xff]  ;;  %v39_v24 = vld [vmem:[%s938_s0 + $0xb0] sm:$0xff]  ;;  %16 = vst.msk [vmem:[#allocation3] sm:$0x3] %vm14_vm0, %v550_v1  ;;  %vm167_vm7 = vcmask 523712  }
   0x5   :  { %51 = vadd.xlane.f32.xlu0 %v50_v7  ;;  %v22_v19 = vld [vmem:[%s938_s0 + $0x28] sm:$0xff]  ;;  %v80_v20 = vadd.f32 %v38_v17, %v37_v16  ;;  %v245_v22 = vmax.f32 %v37_v16, %v38_v17  ;;  %v40_v25 = vld [vmem:[%s938_s0 + $0xb8] sm:$0xff]  ;;  %v23_v26 = vld [vmem:[%s938_s0 + $0x30] sm:$0xff]  ;;  %vm208_vm8 = vcmask 1041409   ;;  %vm435_vm9 = vcmask 7168  }
   0x6   :  { %v56_v21 = vadd.f32 %v22_v19, %v21_v18  ;;  %v221_v23 = vmax.f32 %v21_v18, %v22_v19  ;;  %v24_v27 = vld [vmem:[%s938_s0 + $0x38] sm:$0xff]  ;;  %v83_v28 = vadd.f32 %v40_v25, %v39_v24  ;;  %v248_v30 = vmax.f32 %v39_v24, %v40_v25  ;;  %v41_v32 = vld [vmem:[%s938_s0 + $0xc0] sm:$0xff]  ;;  %v42_v33 = vld [vmem:[%s938_s0 + $0xc8] sm:$0xff] }
   0x7   :  { %v59_v29 = vadd.f32 %v24_v27, %v23_v26  ;;  %v224_v31 = vmax.f32 %v23_v26, %v24_v27  ;;  %v25_v34 = vld [vmem:[%s938_s0 + $0x40] sm:$0xff]  ;;  %v26_v35 = vld [vmem:[%s938_s0 + $0x48] sm:$0xff]  ;;  %v86_v36 = vadd.f32 %v42_v33, %v41_v32  ;;  %v251_v38 = vmax.f32 %v41_v32, %v42_v33  ;;  %v43_v40 = vld [vmem:[%s938_s0 + $0xd0] sm:$0xff] }
   0x8   :  { %78 = vadd.xlane.f32.xlu1 %v77_v10  ;;  %v62_v37 = vadd.f32 %v26_v35, %v25_v34  ;;  %v227_v39 = vmax.f32 %v25_v34, %v26_v35  ;;  %v44_v41 = vld [vmem:[%s938_s0 + $0xd8] sm:$0xff]  ;;  %v27_v42 = vld [vmem:[%s938_s0 + $0x50] sm:$0xff]  ;;  %v45_v48 = vld [vmem:[%s938_s0 + $0xe0] sm:$0xff]  ;;  %v114_v19 = vlaneseq }
   0x9   :  { %54 = vadd.xlane.f32.xlu0 %v53_v11  ;;  %v28_v43 = vld [vmem:[%s938_s0 + $0x58] sm:$0xff]  ;;  %v89_v44 = vadd.f32 %v44_v41, %v43_v40  ;;  %v254_v46 = vmax.f32 %v43_v40, %v44_v41  ;;  %v46_v49 = vld [vmem:[%s938_s0 + $0xe8] sm:$0xff]  ;;  %v29_v50 = vld [vmem:[%s938_s0 + $0x60] sm:$0xff] }
   0xa   :  { %v65_v45 = vadd.f32 %v28_v43, %v27_v42  ;;  %v230_v47 = vmax.f32 %v27_v42, %v28_v43  ;;  %v30_v51 = vld [vmem:[%s938_s0 + $0x68] sm:$0xff]  ;;  %v92_v52 = vadd.f32 %v46_v49, %v45_v48  ;;  %v257_v54 = vmax.f32 %v45_v48, %v46_v49  ;;  %v47_v56 = vld [vmem:[%s938_s0 + $0xf0] sm:$0xff]  ;;  %v48_v57 = vld [vmem:[%s938_s0 + $0xf8] sm:$0xff] }
   0xb   :  { %v68_v53 = vadd.f32 %v30_v51, %v29_v50  ;;  %v233_v55 = vmax.f32 %v29_v50, %v30_v51  ;;  %v31_v58 = vld [vmem:[%s938_s0 + $0x70] sm:$0xff]  ;;  %v32_v59 = vld [vmem:[%s938_s0 + $0x78] sm:$0xff]  ;;  %v95_v60 = vadd.f32 %v48_v57, %v47_v56  ;;  %v260_v62 = vmax.f32 %v47_v56, %v48_v57 }
   0xc   :  { %219 = vmax.xlane.f32.xlu1 %v218_v12  ;;  %v71_v61 = vadd.f32 %v32_v59, %v31_v58  ;;  %v236_v63 = vmax.f32 %v31_v58, %v32_v59  ;;  %v704_v25 = vshrl.u32 %v114_v19, 7 }
   0xd   :  { %216 = vmax.xlane.f32.xlu0 %v215_v13 }
  0x10   :  { %243 = vmax.xlane.f32.xlu1 %v242_v14 }
  0x11   :  { %240 = vmax.xlane.f32.xlu0 %v239_v15 }
  0x14   :  { %81 = vadd.xlane.f32.xlu1 %v80_v20 }
  0x15   :  { %57 = vadd.xlane.f32.xlu0 %v56_v21 }
  0x18   :  { %246 = vmax.xlane.f32.xlu1 %v245_v22  ;;  %v115_v22 = vand.u32 127, %v114_v19 }
  0x19   :  { %222 = vmax.xlane.f32.xlu0 %v221_v23 }
  0x1a   :  { %v120_v24 = vadd.s32 4294967288, %v115_v22  ;;  %v127_v26 = vadd.s32 4294967280, %v115_v22  ;;  %v155_v32 = vadd.s32 4294967248, %v115_v22  ;;  %v162_v34 = vadd.s32 4294967240, %v115_v22 }
  0x1b   :  { %v118_v35 = vsub.s32 %v115_v22, %v704_v25 }
  0x1c   :  { %84 = vadd.xlane.f32.xlu1 %v83_v28  ;;  %v134_v28 = vadd.s32 4294967272, %v115_v22  ;;  %v123_v33 = vsub.s32 %v120_v24, %v704_v25  ;;  %v727_v42 = vsub.s32 %v155_v32, %v704_v25 }
  0x1d   :  { %60 = vadd.xlane.f32.xlu0 %v59_v29  ;;  %v141_v29 = vadd.s32 4294967264, %v115_v22 }
  0x20   :  { %249 = vmax.xlane.f32.xlu1 %v248_v30 }
  0x21   :  { %225 = vmax.xlane.f32.xlu0 %v224_v31  ;;  %v148_v31 = vadd.s32 4294967256, %v115_v22 }
  0x23   :  { %v724_v41 = vsub.s32 %v148_v31, %v704_v25 }
  0x24   :  { %87 = vadd.xlane.f32.xlu1 %v86_v36  ;;  %v130_v36 = vsub.s32 %v127_v26, %v704_v25 }
  0x25   :  { %63 = vadd.xlane.f32.xlu0 %v62_v37 }
  0x28   :  { %252 = vmax.xlane.f32.xlu1 %v251_v38  ;;  %v716_v38 = vsub.s32 %v134_v28, %v704_v25 }
  0x29   :  { %228 = vmax.xlane.f32.xlu0 %v227_v39  ;;  %v719_v39 = vsub.s32 %v141_v29, %v704_v25 }
  0x2c   :  { %90 = vadd.xlane.f32.xlu1 %v89_v44 }
  0x2d   :  { %66 = vadd.xlane.f32.xlu0 %v65_v45  ;;  %v732_v45 = vsub.s32 %v162_v34, %v704_v25 }
  0x30   :  { %255 = vmax.xlane.f32.xlu1 %v254_v46 }
  0x31   :  { %231 = vmax.xlane.f32.xlu0 %v230_v47 }
  0x34   :  { %93 = vadd.xlane.f32.xlu1 %v92_v52 }
  0x35   :  { %69 = vadd.xlane.f32.xlu0 %v68_v53 }
  0x38   :  { %258 = vmax.xlane.f32.xlu1 %v257_v54 }
  0x39   :  { %234 = vmax.xlane.f32.xlu0 %v233_v55 }
  0x3c   :  { %96 = vadd.xlane.f32.xlu1 %v95_v60 }
  0x3d   :  { %72 = vadd.xlane.f32.xlu0 %v71_v61 }
  0x40   :  { %261 = vmax.xlane.f32.xlu1 %v260_v62 }
  0x41   :  { %237 = vmax.xlane.f32.xlu0 %v236_v63 }
  0x91   :  { %v664_v2 = vpop.xlane.xlu1 %75 }
  0x92   :  { %v666_v3 = vpop.xlane.xlu0 %51  ;;  %v172_v51 = vrot.slane %v664_v2, %v118_v35 }
  0x93   :  { %v119_v52 = vrot.slane %v666_v3, %v118_v35 }
  0x95   :  { %v668_v4 = vpop.xlane.xlu1 %78 }
  0x96   :  { %v670_v5 = vpop.xlane.xlu0 %54  ;;  %v176_v43 = vrot.slane %v668_v4, %v123_v33 }
  0x97   :  { %v124_v44 = vrot.slane %v670_v5, %v123_v33 }
  0x98   :  { %v177_v59 = vsel %vm125_vm1, %v176_v43, %v172_v51 }
  0x99   :  { %v672_v6 = vpop.xlane.xlu1 %219  ;;  %v126_v60 = vsel %vm125_vm1, %v124_v44, %v119_v52  ;;  %v214_v52 = vld [vmem:[#allocation3] sm:$0x3] }
  0x9a   :  { %v674_v7 = vpop.xlane.xlu0 %216  ;;  %v286_v46 = vrot.slane %v672_v6, %v123_v33 }
  0x9b   :  { %v282_v47 = vrot.slane %v674_v7, %v118_v35 }
  0x9d   :  { %v676_v8 = vpop.xlane.xlu1 %243  ;;  %v287_v62 = vsel %vm125_vm1, %v286_v46, %v282_v47 }
  0x9e   :  { %v678_v9 = vpop.xlane.xlu0 %240  ;;  %v325_v48 = vrot.slane %v676_v8, %v123_v33 }
  0x9f   :  { %v321_v49 = vrot.slane %v678_v9, %v118_v35  ;;  %v49_v35 = vld [vmem:[#allocation2] sm:$0x3] }
  0xa1   :  { %v680_v10 = vpop.xlane.xlu1 %81  ;;  %v326_v63 = vsel %vm125_vm1, %v325_v48, %v321_v49 }
  0xa2   :  { %v682_v11 = vpop.xlane.xlu0 %57  ;;  %v181_v53 = vrot.slane %v680_v10, %v130_v36 }
  0xa3   :  { %v131_v54 = vrot.slane %v682_v11, %v130_v36 }
  0xa4   :  { %v182_v3 = vsel %vm132_vm2, %v181_v53, %v177_v59 }
  0xa5   :  { %v684_v12 = vpop.xlane.xlu1 %246  ;;  %v133_v4 = vsel %vm132_vm2, %v131_v54, %v126_v60 }
  0xa6   :  { %v686_v13 = vpop.xlane.xlu0 %222  ;;  %v330_v56 = vrot.slane %v684_v12, %v130_v36 }
  0xa7   :  { %v291_v57 = vrot.slane %v686_v13, %v130_v36 }
  0xa8   :  { %v331_v8 = vsel %vm132_vm2, %v330_v56, %v326_v63  ;;  %v367_v56 = vsub.s32 0, %v704_v25 }
  0xa9   :  { %v688_v14 = vpop.xlane.xlu1 %84  ;;  %v292_v9 = vsel %vm132_vm2, %v291_v57, %v287_v62 }
  0xaa   :  { %v690_v15 = vpop.xlane.xlu0 %60  ;;  %v186_v58 = vrot.slane %v688_v14, %v716_v38 }
  0xab   :  { %v138_v61 = vrot.slane %v690_v15, %v716_v38 }
  0xac   :  { %v187_v10 = vsel %vm139_vm3, %v186_v58, %v182_v3 }
  0xad   :  { %v692_v16 = vpop.xlane.xlu1 %249  ;;  %v140_v12 = vsel %vm139_vm3, %v138_v61, %v133_v4 }
  0xae   :  { %v694_v17 = vpop.xlane.xlu0 %225  ;;  %v335_v13 = vrot.slane %v692_v16, %v716_v38 }
  0xaf   :  { %v296_v14 = vrot.slane %v694_v17, %v716_v38 }
  0xb0   :  { %v336_v31 = vsel %vm139_vm3, %v335_v13, %v331_v8 }
  0xb1   :  { %v696_v18 = vpop.xlane.xlu1 %87  ;;  %v297_v36 = vsel %vm139_vm3, %v296_v14, %v292_v9 }
  0xb2   :  { %v698_v20 = vpop.xlane.xlu0 %63  ;;  %v191_v0 = vrot.slane %v696_v18, %v719_v39 }
  0xb3   :  { %v145_v1 = vrot.slane %v698_v20, %v719_v39 }
  0xb4   :  { %v192_v18 = vsel %vm146_vm4, %v191_v0, %v187_v10 }
  0xb5   :  { %v700_v21 = vpop.xlane.xlu1 %252  ;;  %v147_v19 = vsel %vm146_vm4, %v145_v1, %v140_v12 }
  0xb6   :  { %v702_v23 = vpop.xlane.xlu0 %228  ;;  %v340_v20 = vrot.slane %v700_v21, %v719_v39 }
  0xb7   :  { %v301_v22 = vrot.slane %v702_v23, %v719_v39 }
  0xb9   :  { %v706_v27 = vpop.xlane.xlu1 %90 }
  0xba   :  { %v708_v30 = vpop.xlane.xlu0 %66  ;;  %v196_v5 = vrot.slane %v706_v27, %v724_v41 }
  0xbb   :  { %v152_v6 = vrot.slane %v708_v30, %v724_v41 }
  0xbc   :  { %v197_v26 = vsel %vm153_vm5, %v196_v5, %v192_v18 }
  0xbd   :  { %v713_v37 = vpop.xlane.xlu1 %255  ;;  %v154_v16 = vsel %vm153_vm5, %v152_v6, %v147_v19 }
  0xbe   :  { %v721_v40 = vpop.xlane.xlu0 %231  ;;  %v345_v17 = vrot.slane %v713_v37, %v724_v41  ;;  %v341_v37 = vsel %vm146_vm4, %v340_v20, %v336_v31 }
  0xbf   :  { %v306_v29 = vrot.slane %v721_v40, %v724_v41  ;;  %v302_v40 = vsel %vm146_vm4, %v301_v22, %v297_v36 }
  0xc0   :  { %v346_v41 = vsel %vm153_vm5, %v345_v17, %v341_v37 }
  0xc1   :  { %v94_v50 = vpop.xlane.xlu1 %93 }
  0xc2   :  { %v70_v55 = vpop.xlane.xlu0 %69  ;;  %v201_v11 = vrot.slane %v94_v50, %v727_v42 }
  0xc3   :  { %v159_v15 = vrot.slane %v70_v55, %v727_v42 }
  0xc4   :  { %v202_v30 = vsel %vm160_vm6, %v201_v11, %v197_v26 }
  0xc5   :  { %v259_v2 = vpop.xlane.xlu1 %258  ;;  %v161_v32 = vsel %vm160_vm6, %v159_v15, %v154_v16 }
  0xc6   :  { %v235_v7 = vpop.xlane.xlu0 %234  ;;  %v350_v21 = vrot.slane %v259_v2, %v727_v42 }
  0xc7   :  { %v311_v33 = vrot.slane %v235_v7, %v727_v42  ;;  %v307_v42 = vsel %vm153_vm5, %v306_v29, %v302_v40 }
  0xc8   :  { %v351_v47 = vsel %vm160_vm6, %v350_v21, %v346_v41 }
  0xc9   :  { %v97_v24 = vpop.xlane.xlu1 %96  ;;  %v312_v50 = vsel %vm160_vm6, %v311_v33, %v307_v42 }
  0xca   :  { %v206_v27 = vrot.slane %v97_v24, %v732_v45  ;;  %v73_v28 = vpop.xlane.xlu0 %72 }
  0xcb   :  { %v166_v23 = vrot.slane %v73_v28, %v732_v45 }
  0xcc   :  { %v207_v34 = vsel %vm167_vm7, %v206_v27, %v202_v30 }
  0xcd   :  { %v168_v38 = vsel %vm167_vm7, %v166_v23, %v161_v32  ;;  %v262_v39 = vpop.xlane.xlu1 %261 }
  0xce   :  { %v209_v43 = vsel %vm208_vm8, %v207_v34, %v168_v38  ;;  %v355_v44 = vrot.slane %v262_v39, %v732_v45  ;;  %v238_v46 = vpop.xlane.xlu0 %237 }
  0xcf   :  { %v211_v48 = vadd.f32 %v209_v43, %v49_v35  ;;  %v316_v49 = vrot.slane %v238_v46, %v732_v45  ;;  %v402_v45 = vsub.s32 1, %v704_v25 }
  0xd0   :  { %v356_v51 = vsel %vm167_vm7, %v355_v44, %v351_v47 }
  0xd1   :  { %213 = vst.msk [vmem:[#allocation2] sm:$0x3] %vm14_vm0, %v211_v48  ;;  %v317_v53 = vsel %vm167_vm7, %v316_v49, %v312_v50 }
  0xd2   :  { %v357_v54 = vsel %vm208_vm8, %v356_v51, %v317_v53 }
  0xd3   :  { %v359_v55 = vmax.f32 %v214_v52, %v357_v54 }
  0xd5   :  { %360 = vst.msk [vmem:[#allocation3] sm:$0x3] %vm14_vm0, %v359_v55 }
  0xd8   :  { %v364_v57 = vld [vmem:[#allocation2] sm:$0x3] }
  0xd9   :  { %v368_v58 = vrot.slane %v364_v57, %v367_v56  ;;  %v403_v59 = vrot.slane %v364_v57, %v402_v45 }
  0xdb   :  { %374 = vbcast.lane.b32.xlu1 %v368_v58, 264  ;;  %370 = vbcast.lane.b32.xlu0 %v368_v58, 256 }
  0xdc   :  { %v452_v60 = vld [vmem:[#allocation3] sm:$0x3] }
  0xdd   :  { %v456_v61 = vrot.slane %v452_v60, %v367_v56  ;;  %v491_v25 = vrot.slane %v452_v60, %v402_v45 }
  0xdf   :  { %378 = vbcast.lane.b32.xlu1 %v368_v58, 272  ;;  %386 = vbcast.lane.b32.xlu0 %v368_v58, 288 }
  0xe3   :  { %382 = vbcast.lane.b32.xlu1 %v368_v58, 280  ;;  %394 = vbcast.lane.b32.xlu0 %v368_v58, 304 }
  0xe7   :  { %390 = vbcast.lane.b32.xlu1 %v368_v58, 296  ;;  %405 = vbcast.lane.b32.xlu0 %v403_v59, 256 }
  0xeb   :  { %398 = vbcast.lane.b32.xlu1 %v368_v58, 312  ;;  %413 = vbcast.lane.b32.xlu0 %v403_v59, 272 }
  0xef   :  { %409 = vbcast.lane.b32.xlu1 %v403_v59, 264  ;;  %421 = vbcast.lane.b32.xlu0 %v403_v59, 288 }
  0xf3   :  { %417 = vbcast.lane.b32.xlu1 %v403_v59, 280  ;;  %429 = vbcast.lane.b32.xlu0 %v403_v59, 304 }
  0xf7   :  { %425 = vbcast.lane.b32.xlu1 %v403_v59, 296  ;;  %458 = vbcast.lane.b32.xlu0 %v456_v61, 256 }
  0xfb   :  { %433 = vbcast.lane.b32.xlu1 %v403_v59, 312  ;;  %466 = vbcast.lane.b32.xlu0 %v456_v61, 272 }
  0xff   :  { %462 = vbcast.lane.b32.xlu1 %v456_v61, 264  ;;  %474 = vbcast.lane.b32.xlu0 %v456_v61, 288 }
 0x103   :  { %470 = vbcast.lane.b32.xlu1 %v456_v61, 280  ;;  %482 = vbcast.lane.b32.xlu0 %v456_v61, 304 }
 0x107   :  { %478 = vbcast.lane.b32.xlu1 %v456_v61, 296  ;;  %493 = vbcast.lane.b32.xlu0 %v491_v25, 256 }
 0x10b   :  { %486 = vbcast.lane.b32.xlu1 %v456_v61, 312  ;;  %501 = vbcast.lane.b32.xlu0 %v491_v25, 272 }
 0x10f   :  { %497 = vbcast.lane.b32.xlu1 %v491_v25, 264  ;;  %509 = vbcast.lane.b32.xlu0 %v491_v25, 288 }
 0x113   :  { %505 = vbcast.lane.b32.xlu1 %v491_v25, 280  ;;  %517 = vbcast.lane.b32.xlu0 %v491_v25, 304 }
 0x117   :  { %513 = vbcast.lane.b32.xlu1 %v491_v25, 296 }
 0x11b   :  { %521 = vbcast.lane.b32.xlu1 %v491_v25, 312 }
 0x14d   :  { %v375_v62 = vpop.permute.xlu1 %374  ;;  %v371_v63 = vpop.permute.xlu0 %370 }
 0x14e   :  { %437 = vst.msk [vmem:[%s939_s1 + $0x8] sm:$0xff] %vm435_vm9, %v375_v62  ;;  %436 = vst.msk [vmem:[%s939_s1] sm:$0xff] %vm435_vm9, %v371_v63 }
 0x151   :  { %v379_v0 = vpop.permute.xlu1 %378  ;;  %v387_v1 = vpop.permute.xlu0 %386 }
 0x152   :  { %438 = vst.msk [vmem:[%s939_s1 + $0x10] sm:$0xff] %vm435_vm9, %v379_v0  ;;  %440 = vst.msk [vmem:[%s939_s1 + $0x20] sm:$0xff] %vm435_vm9, %v387_v1 }
 0x155   :  { %v383_v2 = vpop.permute.xlu1 %382  ;;  %v395_v3 = vpop.permute.xlu0 %394 }
 0x156   :  { %439 = vst.msk [vmem:[%s939_s1 + $0x18] sm:$0xff] %vm435_vm9, %v383_v2  ;;  %442 = vst.msk [vmem:[%s939_s1 + $0x30] sm:$0xff] %vm435_vm9, %v395_v3 }
 0x159   :  { %v391_v4 = vpop.permute.xlu1 %390  ;;  %v406_v5 = vpop.permute.xlu0 %405 }
 0x15a   :  { %441 = vst.msk [vmem:[%s939_s1 + $0x28] sm:$0xff] %vm435_vm9, %v391_v4  ;;  %444 = vst.msk [vmem:[%s939_s1 + $0x40] sm:$0xff] %vm435_vm9, %v406_v5 }
 0x15d   :  { %v399_v6 = vpop.permute.xlu1 %398  ;;  %v414_v7 = vpop.permute.xlu0 %413 }
 0x15e   :  { %443 = vst.msk [vmem:[%s939_s1 + $0x38] sm:$0xff] %vm435_vm9, %v399_v6  ;;  %446 = vst.msk [vmem:[%s939_s1 + $0x50] sm:$0xff] %vm435_vm9, %v414_v7 }
 0x161   :  { %v410_v8 = vpop.permute.xlu1 %409  ;;  %v422_v9 = vpop.permute.xlu0 %421 }
 0x162   :  { %445 = vst.msk [vmem:[%s939_s1 + $0x48] sm:$0xff] %vm435_vm9, %v410_v8  ;;  %448 = vst.msk [vmem:[%s939_s1 + $0x60] sm:$0xff] %vm435_vm9, %v422_v9 }
 0x165   :  { %v418_v10 = vpop.permute.xlu1 %417  ;;  %v430_v11 = vpop.permute.xlu0 %429 }
 0x166   :  { %447 = vst.msk [vmem:[%s939_s1 + $0x58] sm:$0xff] %vm435_vm9, %v418_v10  ;;  %450 = vst.msk [vmem:[%s939_s1 + $0x70] sm:$0xff] %vm435_vm9, %v430_v11 }
 0x169   :  { %v426_v12 = vpop.permute.xlu1 %425  ;;  %v459_v13 = vpop.permute.xlu0 %458 }
 0x16a   :  { %449 = vst.msk [vmem:[%s939_s1 + $0x68] sm:$0xff] %vm435_vm9, %v426_v12  ;;  %523 = vst.msk [vmem:[%s940_s2] sm:$0xff] %vm435_vm9, %v459_v13 }
 0x16d   :  { %v434_v14 = vpop.permute.xlu1 %433  ;;  %v467_v15 = vpop.permute.xlu0 %466 }
 0x16e   :  { %451 = vst.msk [vmem:[%s939_s1 + $0x78] sm:$0xff] %vm435_vm9, %v434_v14  ;;  %525 = vst.msk [vmem:[%s940_s2 + $0x10] sm:$0xff] %vm435_vm9, %v467_v15 }
 0x171   :  { %v463_v18 = vpop.permute.xlu1 %462  ;;  %v475_v19 = vpop.permute.xlu0 %474 }
 0x172   :  { %524 = vst.msk [vmem:[%s940_s2 + $0x8] sm:$0xff] %vm435_vm9, %v463_v18  ;;  %527 = vst.msk [vmem:[%s940_s2 + $0x20] sm:$0xff] %vm435_vm9, %v475_v19 }
 0x175   :  { %v471_v20 = vpop.permute.xlu1 %470  ;;  %v483_v22 = vpop.permute.xlu0 %482 }
 0x176   :  { %526 = vst.msk [vmem:[%s940_s2 + $0x18] sm:$0xff] %vm435_vm9, %v471_v20  ;;  %529 = vst.msk [vmem:[%s940_s2 + $0x30] sm:$0xff] %vm435_vm9, %v483_v22 }
 0x179   :  { %v479_v24 = vpop.permute.xlu1 %478  ;;  %v494_v26 = vpop.permute.xlu0 %493 }
 0x17a   :  { %528 = vst.msk [vmem:[%s940_s2 + $0x28] sm:$0xff] %vm435_vm9, %v479_v24  ;;  %531 = vst.msk [vmem:[%s940_s2 + $0x40] sm:$0xff] %vm435_vm9, %v494_v26 }
 0x17d   :  { %v487_v16 = vpop.permute.xlu1 %486  ;;  %v502_v17 = vpop.permute.xlu0 %501 }
 0x17e   :  { %530 = vst.msk [vmem:[%s940_s2 + $0x38] sm:$0xff] %vm435_vm9, %v487_v16  ;;  %533 = vst.msk [vmem:[%s940_s2 + $0x50] sm:$0xff] %vm435_vm9, %v502_v17 }
 0x181   :  { %v498_v27 = vpop.permute.xlu1 %497  ;;  %v510_v28 = vpop.permute.xlu0 %509 }
 0x182   :  { %532 = vst.msk [vmem:[%s940_s2 + $0x48] sm:$0xff] %vm435_vm9, %v498_v27  ;;  %535 = vst.msk [vmem:[%s940_s2 + $0x60] sm:$0xff] %vm435_vm9, %v510_v28 }
 0x185   :  { %v506_v29 = vpop.permute.xlu1 %505  ;;  %v518_v30 = vpop.permute.xlu0 %517 }
 0x186   :  { %534 = vst.msk [vmem:[%s940_s2 + $0x58] sm:$0xff] %vm435_vm9, %v506_v29  ;;  %537 = vst.msk [vmem:[%s940_s2 + $0x70] sm:$0xff] %vm435_vm9, %v518_v30 }
 0x189   :  { %v514_v21 = vpop.permute.xlu1 %513 }
 0x18a   :  { %536 = vst.msk [vmem:[%s940_s2 + $0x68] sm:$0xff] %vm435_vm9, %v514_v21 }
 0x18d   :  { %v522_v23 = vpop.permute.xlu1 %521 }
 0x18e   :  { %538 = vst.msk [vmem:[%s940_s2 + $0x78] sm:$0xff] %vm435_vm9, %v522_v23 }

</bundles_post_ra>
